<compile_context>
chip_gen: v7x
topology: tpu7x:2x2x1
jax: 0.10.0
libtpu: 0.0.40
codegen_flags: <defaults>
</compile_context>

<pallas_src>
import functools

import jax
import jax.numpy as jnp
from jax.experimental import pallas as pl
from jax.experimental.pallas import tpu as pltpu


def _round_up(x, m):
    return ((x + m - 1) // m) * m


def _cdiv(a, b):
    return -(-a // b)


# ----------------------------------------------------------------------------
# Pallas kernel: full VAE forward on one batch tile.
# ----------------------------------------------------------------------------
def _vae_kernel(
    x_ref,        # (TB, D_in_pad)  bf16 flattened input tile
    eps_ref,      # (TB, Z)         f32 standard-normal noise
    w_enc1_ref,   # (D_in_pad, H)   bf16
    b_enc1_ref,   # (1, H)          f32
    w_head_ref,   # (H, 2Z)         bf16  (fused mu | logvar head)
    b_head_ref,   # (1, 2Z)         f32
    w_dec1_ref,   # (Z, H)          bf16
    b_dec1_ref,   # (1, H)          f32
    w_dec2_ref,   # (H, D_in_pad)   bf16
    b_dec2_ref,   # (1, D_in_pad)   f32
    recon_ref,    # out: (TB, D_in_pad)   bf16
    stats_ref,    # out: (TB, PACK)       f32  [mean | logvar | z | zero-pad]
    *,
    latent_dim,
    pack_width,
):
    x = x_ref[...]                                        # bf16, fed directly to MXU

    # ---------------- encoder trunk ----------------
    h_enc = jnp.dot(x, w_enc1_ref[...], preferred_element_type=jnp.float32)
    h_enc = jnp.maximum(h_enc + b_enc1_ref[...], 0.0)     # ReLU (f32 on VPU)

    # fused mean/logvar head: one MXU pass, static lane split only where needed
    head = jnp.dot(h_enc.astype(jnp.bfloat16), w_head_ref[...],
                   preferred_element_type=jnp.float32) + b_head_ref[...]
    mean = head[:, :latent_dim]
    logvar = head[:, latent_dim:2 * latent_dim]

    # ------------- reparameterize (training mode) -------------
    std = jnp.exp(0.5 * logvar)                           # EUP
    z = mean + std * eps_ref[...]

    # ---------------- decoder ----------------
    h_dec = jnp.dot(z.astype(jnp.bfloat16), w_dec1_ref[...],
                    preferred_element_type=jnp.float32)
    h_dec = jnp.maximum(h_dec + b_dec1_ref[...], 0.0)     # ReLU
    logits = jnp.dot(h_dec.astype(jnp.bfloat16), w_dec2_ref[...],
                     preferred_element_type=jnp.float32) + b_dec2_ref[...]
    # sigmoid(x) == 0.5*tanh(0.5*x) + 0.5 : a single EUP transcendental per element
    recon = 0.5 * jnp.tanh(0.5 * logits) + 0.5

    recon_ref[...] = recon.astype(recon_ref.dtype)        # bf16, lane-dense store

    # pack [mean|logvar] (already lane-contiguous in `head`), z, zero-pad into one
    # lane-dense 128-wide slab
    pieces = [head[:, :2 * latent_dim], z]
    pad = pack_width - 3 * latent_dim
    if pad > 0:
        pieces.append(jnp.zeros((z.shape[0], pad), jnp.float32))
    stats_ref[...] = jnp.concatenate(pieces, axis=-1).astype(stats_ref.dtype)


# ----------------------------------------------------------------------------
# Parameter init (deterministic synthetic, fan-in scaled). Weights in bf16,
# biases in f32; mu/logvar heads pre-fused into a single (H, 2Z) matrix.
# ----------------------------------------------------------------------------
def init_vae_params(key, d_in, hidden, latent):
    ks = jax.random.split(key, 5)

    def dense(k, fan_in, fan_out):
        w = jax.random.normal(k, (fan_in, fan_out), jnp.float32) / jnp.sqrt(
            jnp.float32(fan_in)
        )
        b = jnp.zeros((1, fan_out), jnp.float32)
        return w.astype(jnp.bfloat16), b

    w_enc1, b_enc1 = dense(ks[0], d_in, hidden)
    w_mu, b_mu = dense(ks[1], hidden, latent)
    w_lv, b_lv = dense(ks[2], hidden, latent)
    w_head = jnp.concatenate([w_mu, w_lv], axis=1)        # (H, 2Z) bf16
    b_head = jnp.concatenate([b_mu, b_lv], axis=1)        # (1, 2Z) f32
    w_dec1, b_dec1 = dense(ks[3], latent, hidden)
    w_dec2, b_dec2 = dense(ks[4], hidden, d_in)
    return (w_enc1, b_enc1, w_head, b_head, w_dec1, b_dec1, w_dec2, b_dec2)


# ----------------------------------------------------------------------------
# Wrapper: lane/batch padding, VMEM-aware batch tiling, pallas_call, glue.
# ----------------------------------------------------------------------------
@functools.partial(jax.jit, static_argnames=("latent_dim",))
def vae_forward(x_nchw, eps, params, latent_dim):
    """Forward pass matching torch VAE.forward (training mode).

    Returns (reconstruct, (mean, logvar), latent_sample) with
      reconstruct : (B, C, H, W)  float32 (carries bf16 precision)
      mean, logvar, latent_sample : (B, latent_dim) float32
    """
    B, C, H, W = x_nchw.shape
    d_in = C * H * W
    d_in_pad = _round_up(d_in, 128)        # lane-dense recon stores

    x_flat = x_nchw.reshape(B, d_in).astype(jnp.bfloat16)
    (w_enc1, b_enc1, w_head, b_head, w_dec1, b_dec1, w_dec2, b_dec2) = params
    if d_in_pad != d_in:
        x_flat = jnp.pad(x_flat, ((0, 0), (0, d_in_pad - d_in)))
        w_enc1 = jnp.pad(w_enc1, ((0, d_in_pad - d_in), (0, 0)))
        w_dec2 = jnp.pad(w_dec2, ((0, 0), (0, d_in_pad - d_in)))
        b_dec2 = jnp.pad(b_dec2, ((0, 0), (0, d_in_pad - d_in)))

    pack_width = max(128, _round_up(3 * latent_dim, 128))

    # --- batch tiling: VMEM-budgeted tile rows, >=2 tiles for v7x megacore ---
    pb = _round_up(B, 8)                   # sublane alignment
    # double-buffered per-row tile bytes: x bf16 + recon bf16 + eps f32 + stats f32
    bytes_per_row = 2 * (d_in_pad * 2 + d_in_pad * 2 + latent_dim * 4 + pack_width * 4)
    weight_bytes = 2 * sum(
        a.size * a.dtype.itemsize
        for a in (w_enc1, b_enc1, w_head, b_head, w_dec1, b_dec1, w_dec2, b_dec2)
    )
    # conservative budget: fits v5e's 16 MiB default scoped VMEM and v7x's 32 MiB default
    VMEM_BUDGET = 12 * 1024 * 1024
    tb_cap = (VMEM_BUDGET - weight_bytes) // bytes_per_row
    tb_cap = max(8, (tb_cap // 8) * 8)
    tb_cap = min(tb_cap, 512)              # 512-row tiles already sit near the HBM roofline
    # at least 2 tiles (when possible) so ("parallel",) shards across v7x's two TCs
    n_tiles = max(_cdiv(pb, tb_cap), 2 if pb >= 16 else 1)
    tb = _round_up(_cdiv(pb, n_tiles), 8)
    pb = tb * _cdiv(pb, tb)                # final padded batch (padding <= tb - 1 rows)

    eps_p = eps.astype(jnp.float32)
    if pb != B:
        x_flat = jnp.pad(x_flat, ((0, pb - B), (0, 0)))
        eps_p = jnp.pad(eps_p, ((0, pb - B), (0, 0)))

    grid = (pb // tb,)

    # weights/biases: constant block index -> loaded once, VMEM-resident across batch tiles
    def const_spec(arr):
        return pl.BlockSpec(arr.shape, lambda i: (0, 0))

    kernel = functools.partial(
        _vae_kernel, latent_dim=latent_dim, pack_width=pack_width
    )

    recon_flat, stats = pl.pallas_call(
        kernel,
        out_shape=(
            jax.ShapeDtypeStruct((pb, d_in_pad), jnp.bfloat16),
            jax.ShapeDtypeStruct((pb, pack_width), jnp.float32),
        ),
        grid_spec=pltpu.PrefetchScalarGridSpec(
            num_scalar_prefetch=0,
            grid=grid,
            in_specs=[
                pl.BlockSpec((tb, d_in_pad), lambda i: (i, 0)),    # x tile (bf16)
                pl.BlockSpec((tb, latent_dim), lambda i: (i, 0)),  # eps tile
                const_spec(w_enc1), const_spec(b_enc1),
                const_spec(w_head), const_spec(b_head),
                const_spec(w_dec1), const_spec(b_dec1),
                const_spec(w_dec2), const_spec(b_dec2),
            ],
            out_specs=(
                pl.BlockSpec((tb, d_in_pad), lambda i: (i, 0)),
                pl.BlockSpec((tb, pack_width), lambda i: (i, 0)),
            ),
        ),
        compiler_params=pltpu.CompilerParams(
            dimension_semantics=("parallel",),
        ),
    )(x_flat, eps_p, w_enc1, b_enc1, w_head, b_head, w_dec1, b_dec1, w_dec2, b_dec2)

    reconstruct = recon_flat[:B, :d_in].astype(jnp.float32).reshape(B, C, H, W)
    mean = stats[:B, :latent_dim]
    logvar = stats[:B, latent_dim:2 * latent_dim]
    latent_sample = stats[:B, 2 * latent_dim:3 * latent_dim]
    return reconstruct, (mean, logvar), latent_sample


if __name__ == "__main__":
    # Small shapes consistent with the module's (batch, n_chan, height, width).
    B, C, H, W = 2, 4, 16, 16
    HIDDEN, LATENT = 32, 8
    D_IN = C * H * W

    key = jax.random.PRNGKey(0)
    k_x, k_eps, k_params = jax.random.split(key, 3)

    x = jax.random.uniform(k_x, (B, C, H, W), jnp.float32)      # image-like input
    eps = jax.random.normal(k_eps, (B, LATENT), jnp.float32)    # reparam noise
    # TODO(synk): eps could be generated in-kernel via pltpu.prng_*; kept external
    # for bitwise reproducibility against the reference.
    params = init_vae_params(k_params, D_IN, HIDDEN, LATENT)

    reconstruct, (mean, logvar), latent_sample = vae_forward(x, eps, params, LATENT)
    jax.block_until_ready((reconstruct, mean, logvar, latent_sample))

    # Pure-JAX reference mirroring the kernel math (bf16 matmul operands, f32 acc,
    # bf16 reconstruction storage).
    x_flat = x.reshape(B, D_IN)
    (w1, b1, wh, bh, w3, b3, w4, b4) = params

    def bdot(a, w):
        return jnp.dot(a.astype(jnp.bfloat16), w, preferred_element_type=jnp.float32)

    h = jnp.maximum(bdot(x_flat, w1) + b1, 0.0)
    head = bdot(h, wh) + bh
    mean_ref = head[:, :LATENT]
    logvar_ref = head[:, LATENT:2 * LATENT]
    z_ref = mean_ref + jnp.exp(0.5 * logvar_ref) * eps
    hd = jnp.maximum(bdot(z_ref, w3) + b3, 0.0)
    recon_ref = (
        jax.nn.sigmoid(bdot(hd, w4) + b4)
        .astype(jnp.bfloat16).astype(jnp.float32)   # kernel stores recon in bf16
        .reshape(B, C, H, W)
    )

    assert jnp.allclose(mean, mean_ref, atol=2e-3, rtol=2e-3)
    assert jnp.allclose(logvar, logvar_ref, atol=2e-3, rtol=2e-3)
    assert jnp.allclose(latent_sample, z_ref, atol=2e-3, rtol=2e-3)
    assert jnp.allclose(reconstruct, recon_ref, atol=2e-3, rtol=2e-3)
    assert reconstruct.shape == (B, C, H, W)
    assert mean.shape == (B, LATENT) and latent_sample.shape == (B, LATENT)

    print("KERNEL_OK")
</pallas_src>

<mosaic_0001>
module attributes {stable_mosaic.version = 11 : i64} {
  func.func @_vae_kernel(%arg0: i32, %arg1: memref<8x1024xbf16, #tpu.memory_space<vmem>>, %arg2: memref<8x8xf32, #tpu.memory_space<vmem>>, %arg3: memref<1024x32xbf16, #tpu.memory_space<vmem>>, %arg4: memref<1x32xf32, #tpu.memory_space<vmem>>, %arg5: memref<32x16xbf16, #tpu.memory_space<vmem>>, %arg6: memref<1x16xf32, #tpu.memory_space<vmem>>, %arg7: memref<8x32xbf16, #tpu.memory_space<vmem>>, %arg8: memref<1x32xf32, #tpu.memory_space<vmem>>, %arg9: memref<32x1024xbf16, #tpu.memory_space<vmem>>, %arg10: memref<1x1024xf32, #tpu.memory_space<vmem>>, %arg11: memref<8x1024xbf16, #tpu.memory_space<vmem>>, %arg12: memref<8x128xf32, #tpu.memory_space<vmem>>) attributes {dimension_semantics = [#tpu.dimension_semantics<parallel>], iteration_bounds = array<i64: 1>, scalar_prefetch = 0 : i64, scratch_operands = 0 : i64, tpu.core_type = #tpu.core_type<tc>, window_params = [{transform_indices = @transform_0, window_bounds = array<i64: 8, 1024>}, {transform_indices = @transform_1, window_bounds = array<i64: 8, 8>}, {pipeline_mode = #tpu.pipeline_mode<synchronous>, transform_indices = @transform_2, window_bounds = array<i64: 1024, 32>}, {pipeline_mode = #tpu.pipeline_mode<synchronous>, transform_indices = @transform_3, window_bounds = array<i64: 1, 32>}, {pipeline_mode = #tpu.pipeline_mode<synchronous>, transform_indices = @transform_4, window_bounds = array<i64: 32, 16>}, {pipeline_mode = #tpu.pipeline_mode<synchronous>, transform_indices = @transform_5, window_bounds = array<i64: 1, 16>}, {pipeline_mode = #tpu.pipeline_mode<synchronous>, transform_indices = @transform_6, window_bounds = array<i64: 8, 32>}, {pipeline_mode = #tpu.pipeline_mode<synchronous>, transform_indices = @transform_7, window_bounds = array<i64: 1, 32>}, {pipeline_mode = #tpu.pipeline_mode<synchronous>, transform_indices = @transform_8, window_bounds = array<i64: 32, 1024>}, {pipeline_mode = #tpu.pipeline_mode<synchronous>, transform_indices = @transform_9, window_bounds = array<i64: 1, 1024>}, {transform_indices = @transform_10, window_bounds = array<i64: 8, 1024>}, {transform_indices = @transform_11, window_bounds = array<i64: 8, 128>}]} {
    %c0 = arith.constant 0 : index
    %c0_0 = arith.constant 0 : index
    %0 = vector.load %arg1[%c0, %c0_0] : memref<8x1024xbf16, #tpu.memory_space<vmem>>, vector<8x1024xbf16>
    %c0_1 = arith.constant 0 : index
    %c0_2 = arith.constant 0 : index
    %1 = vector.load %arg3[%c0_1, %c0_2] : memref<1024x32xbf16, #tpu.memory_space<vmem>>, vector<1024x32xbf16>
    %cst = arith.constant dense<0.000000e+00> : vector<8x32xf32>
    %2 = tpu.matmul %0, %1, %cst {dimension_numbers = #tpu.dot_dimension_numbers<[1], [0], [0], [1], [0, 0, 1, 1], [], []>} : vector<8x1024xbf16>, vector<1024x32xbf16>, vector<8x32xf32> -> vector<8x32xf32>
    %c0_3 = arith.constant 0 : index
    %c0_4 = arith.constant 0 : index
    %3 = vector.load %arg4[%c0_3, %c0_4] : memref<1x32xf32, #tpu.memory_space<vmem>>, vector<1x32xf32>
    %4 = vector.broadcast %3 : vector<1x32xf32> to vector<8x32xf32>
    %5 = arith.addf %2, %4 : vector<8x32xf32>
    %cst_5 = arith.constant 0.000000e+00 : f32
    %6 = vector.broadcast %cst_5 : f32 to vector<8x32xf32>
    %7 = arith.maximumf %5, %6 : vector<8x32xf32>
    %8 = arith.truncf %7 : vector<8x32xf32> to vector<8x32xbf16>
    %c0_6 = arith.constant 0 : index
    %c0_7 = arith.constant 0 : index
    %9 = vector.load %arg5[%c0_6, %c0_7] : memref<32x16xbf16, #tpu.memory_space<vmem>>, vector<32x16xbf16>
    %cst_8 = arith.constant dense<0.000000e+00> : vector<8x16xf32>
    %10 = tpu.matmul %8, %9, %cst_8 {dimension_numbers = #tpu.dot_dimension_numbers<[1], [0], [0], [1], [0, 0, 1, 1], [], []>} : vector<8x32xbf16>, vector<32x16xbf16>, vector<8x16xf32> -> vector<8x16xf32>
    %c0_9 = arith.constant 0 : index
    %c0_10 = arith.constant 0 : index
    %11 = vector.load %arg6[%c0_9, %c0_10] : memref<1x16xf32, #tpu.memory_space<vmem>>, vector<1x16xf32>
    %12 = vector.broadcast %11 : vector<1x16xf32> to vector<8x16xf32>
    %13 = arith.addf %10, %12 : vector<8x16xf32>
    %14 = vector.extract_strided_slice %13 {offsets = [0, 0], sizes = [8, 8], strides = [1, 1]} : vector<8x16xf32> to vector<8x8xf32>
    %15 = vector.extract_strided_slice %13 {offsets = [0, 8], sizes = [8, 8], strides = [1, 1]} : vector<8x16xf32> to vector<8x8xf32>
    %cst_11 = arith.constant 5.000000e-01 : f32
    %16 = vector.broadcast %cst_11 : f32 to vector<8x8xf32>
    %17 = arith.mulf %16, %15 : vector<8x8xf32>
    %18 = math.exp %17 : vector<8x8xf32>
    %c0_12 = arith.constant 0 : index
    %c0_13 = arith.constant 0 : index
    %19 = vector.load %arg2[%c0_12, %c0_13] : memref<8x8xf32, #tpu.memory_space<vmem>>, vector<8x8xf32>
    %20 = arith.mulf %18, %19 : vector<8x8xf32>
    %21 = arith.addf %14, %20 : vector<8x8xf32>
    %22 = arith.truncf %21 : vector<8x8xf32> to vector<8x8xbf16>
    %c0_14 = arith.constant 0 : index
    %c0_15 = arith.constant 0 : index
    %23 = vector.load %arg7[%c0_14, %c0_15] : memref<8x32xbf16, #tpu.memory_space<vmem>>, vector<8x32xbf16>
    %cst_16 = arith.constant dense<0.000000e+00> : vector<8x32xf32>
    %24 = tpu.matmul %22, %23, %cst_16 {dimension_numbers = #tpu.dot_dimension_numbers<[1], [0], [0], [1], [0, 0, 1, 1], [], []>} : vector<8x8xbf16>, vector<8x32xbf16>, vector<8x32xf32> -> vector<8x32xf32>
    %c0_17 = arith.constant 0 : index
    %c0_18 = arith.constant 0 : index
    %25 = vector.load %arg8[%c0_17, %c0_18] : memref<1x32xf32, #tpu.memory_space<vmem>>, vector<1x32xf32>
    %26 = vector.broadcast %25 : vector<1x32xf32> to vector<8x32xf32>
    %27 = arith.addf %24, %26 : vector<8x32xf32>
    %cst_19 = arith.constant 0.000000e+00 : f32
    %28 = vector.broadcast %cst_19 : f32 to vector<8x32xf32>
    %29 = arith.maximumf %27, %28 : vector<8x32xf32>
    %30 = arith.truncf %29 : vector<8x32xf32> to vector<8x32xbf16>
    %c0_20 = arith.constant 0 : index
    %c0_21 = arith.constant 0 : index
    %31 = vector.load %arg9[%c0_20, %c0_21] : memref<32x1024xbf16, #tpu.memory_space<vmem>>, vector<32x1024xbf16>
    %cst_22 = arith.constant dense<0.000000e+00> : vector<8x1024xf32>
    %32 = tpu.matmul %30, %31, %cst_22 {dimension_numbers = #tpu.dot_dimension_numbers<[1], [0], [0], [1], [0, 0, 1, 1], [], []>} : vector<8x32xbf16>, vector<32x1024xbf16>, vector<8x1024xf32> -> vector<8x1024xf32>
    %c0_23 = arith.constant 0 : index
    %c0_24 = arith.constant 0 : index
    %33 = vector.load %arg10[%c0_23, %c0_24] : memref<1x1024xf32, #tpu.memory_space<vmem>>, vector<1x1024xf32>
    %34 = vector.broadcast %33 : vector<1x1024xf32> to vector<8x1024xf32>
    %35 = arith.addf %32, %34 : vector<8x1024xf32>
    %cst_25 = arith.constant 5.000000e-01 : f32
    %36 = vector.broadcast %cst_25 : f32 to vector<8x1024xf32>
    %37 = arith.mulf %36, %35 : vector<8x1024xf32>
    %38 = math.tanh %37 : vector<8x1024xf32>
    %cst_26 = arith.constant 5.000000e-01 : f32
    %39 = vector.broadcast %cst_26 : f32 to vector<8x1024xf32>
    %40 = arith.mulf %39, %38 : vector<8x1024xf32>
    %cst_27 = arith.constant 5.000000e-01 : f32
    %41 = vector.broadcast %cst_27 : f32 to vector<8x1024xf32>
    %42 = arith.addf %40, %41 : vector<8x1024xf32>
    %43 = arith.truncf %42 : vector<8x1024xf32> to vector<8x1024xbf16>
    %c0_28 = arith.constant 0 : index
    %c0_29 = arith.constant 0 : index
    %44 = vector.load %arg11[%c0_28, %c0_29] : memref<8x1024xbf16, #tpu.memory_space<vmem>>, vector<8x1024xbf16>
    tpu.vector_store %arg11[%c0_28, %c0_29], %43 {strides = array<i32>} : memref<8x1024xbf16, #tpu.memory_space<vmem>>, vector<8x1024xbf16>,
    %cst_30 = arith.constant 0.000000e+00 : f32
    %45 = vector.broadcast %cst_30 : f32 to vector<8x104xf32>
    %46 = tpu.concatenate %13, %21, %45 in 1 : vector<8x16xf32>, vector<8x8xf32>, vector<8x104xf32> -> vector<8x128xf32>
    %c0_31 = arith.constant 0 : index
    %c0_32 = arith.constant 0 : index
    %47 = vector.load %arg12[%c0_31, %c0_32] : memref<8x128xf32, #tpu.memory_space<vmem>>, vector<8x128xf32>
    tpu.vector_store %arg12[%c0_31, %c0_32], %46 {strides = array<i32>} : memref<8x128xf32, #tpu.memory_space<vmem>>, vector<8x128xf32>,
    return
  }
  func.func @transform_0(%arg0: i32) -> (i32, i32) {
    %c0_i32 = arith.constant 0 : i32
    %c0_i32_0 = arith.constant 0 : i32
    return %arg0, %c0_i32 : i32, i32
  }
  func.func @transform_1(%arg0: i32) -> (i32, i32) {
    %c0_i32 = arith.constant 0 : i32
    %c0_i32_0 = arith.constant 0 : i32
    return %arg0, %c0_i32 : i32, i32
  }
  func.func @transform_2(%arg0: i32) -> (i32, i32) {
    %c0_i32 = arith.constant 0 : i32
    %c0_i32_0 = arith.constant 0 : i32
    %c0_i32_1 = arith.constant 0 : i32
    return %c0_i32, %c0_i32_0 : i32, i32
  }
  func.func @transform_3(%arg0: i32) -> (i32, i32) {
    %c0_i32 = arith.constant 0 : i32
    %c0_i32_0 = arith.constant 0 : i32
    %c0_i32_1 = arith.constant 0 : i32
    return %c0_i32, %c0_i32_0 : i32, i32
  }
  func.func @transform_4(%arg0: i32) -> (i32, i32) {
    %c0_i32 = arith.constant 0 : i32
    %c0_i32_0 = arith.constant 0 : i32
    %c0_i32_1 = arith.constant 0 : i32
    return %c0_i32, %c0_i32_0 : i32, i32
  }
  func.func @transform_5(%arg0: i32) -> (i32, i32) {
    %c0_i32 = arith.constant 0 : i32
    %c0_i32_0 = arith.constant 0 : i32
    %c0_i32_1 = arith.constant 0 : i32
    return %c0_i32, %c0_i32_0 : i32, i32
  }
  func.func @transform_6(%arg0: i32) -> (i32, i32) {
    %c0_i32 = arith.constant 0 : i32
    %c0_i32_0 = arith.constant 0 : i32
    %c0_i32_1 = arith.constant 0 : i32
    return %c0_i32, %c0_i32_0 : i32, i32
  }
  func.func @transform_7(%arg0: i32) -> (i32, i32) {
    %c0_i32 = arith.constant 0 : i32
    %c0_i32_0 = arith.constant 0 : i32
    %c0_i32_1 = arith.constant 0 : i32
    return %c0_i32, %c0_i32_0 : i32, i32
  }
  func.func @transform_8(%arg0: i32) -> (i32, i32) {
    %c0_i32 = arith.constant 0 : i32
    %c0_i32_0 = arith.constant 0 : i32
    %c0_i32_1 = arith.constant 0 : i32
    return %c0_i32, %c0_i32_0 : i32, i32
  }
  func.func @transform_9(%arg0: i32) -> (i32, i32) {
    %c0_i32 = arith.constant 0 : i32
    %c0_i32_0 = arith.constant 0 : i32
    %c0_i32_1 = arith.constant 0 : i32
    return %c0_i32, %c0_i32_0 : i32, i32
  }
  func.func @transform_10(%arg0: i32) -> (i32, i32) {
    %c0_i32 = arith.constant 0 : i32
    %c0_i32_0 = arith.constant 0 : i32
    return %arg0, %c0_i32 : i32, i32
  }
  func.func @transform_11(%arg0: i32) -> (i32, i32) {
    %c0_i32 = arith.constant 0 : i32
    %c0_i32_0 = arith.constant 0 : i32
    return %arg0, %c0_i32 : i32, i32
  }
}

</mosaic_0001>

<bundles_post_ra>
// kernel: vae_forward.1
= control target key start
LH: loop header
LB: loop body
LE: loop exit
PB: predicated region body
PF: predicated region fallthrough
CT: control target
= control target key end

     0   :  { %vm1594_vm0 = vmmov 0   ;;  %s1595_s24 = smov 8   ;;  %vm774_vm1 = vcmask 261120   ;;  %vm845_vm2 = vcmask 1043456   ;;  %s1596_s28 = smov 120   ;;  %vm841_vm3 = vcmask 64512   ;;  %s1955_s2 = inlined_call_operand.vmem [shape: bf16[1024,32], index: 2, kind: input, shape index: {}]   ;;  %s1956_s0 = inlined_call_operand.vmem [shape: bf16[8,1024], index: 0, kind: input, shape index: {}]   ;;  %s1957_s4 = inlined_call_operand.vmem [shape: bf16[32,16], index: 4, kind: input, shape index: {}]   ;;  %s1958_s1 = inlined_call_operand.vmem [shape: f32[8,8], index: 1, kind: input, shape index: {}]   ;;  %s1959_s3 = inlined_call_operand.vmem [shape: f32[1,32], index: 3, kind: input, shape index: {}]   ;;  %s1960_s6 = inlined_call_operand.vmem [shape: bf16[8,32], index: 6, kind: input, shape index: {}]   ;;  %s1961_s5 = inlined_call_operand.vmem [shape: f32[1,16], index: 5, kind: input, shape index: {}]   ;;  %s1962_s8 = inlined_call_operand.vmem [shape: bf16[32,1024], index: 8, kind: input, shape index: {}]   ;;  %s1963_s11 = inlined_call_operand.vmem [shape: f32[8,128], index: 11, kind: output, shape index: {1}]   ;;  %s1964_s7 = inlined_call_operand.vmem [shape: f32[1,32], index: 7, kind: input, shape index: {}]   ;;  %s1965_s9 = inlined_call_operand.vmem [shape: f32[1,1024], index: 9, kind: input, shape index: {}]   ;;  %s1966_s10 = inlined_call_operand.vmem [shape: bf16[8,1024], index: 10, kind: output, shape index: {0}]  }
   0x1   :  { %v1501_v0 = vld [vmem:[%s1955_s2 + $0x40] sm:$0xff]   ;;  %v1505_v4 = vld [vmem:[%s1955_s2 + $0x48] sm:$0xff]   ;;  %v1509_v8 = vld [vmem:[%s1955_s2 + $0x50] sm:$0xff]   ;;  %s1597_s16 = smov 16   ;;  %vm1268_vm4 = vcmask 130048   ;;  %vm1270_vm5 = vcmask 195584  }
   0x2   :  { %v1502_v1 = vld [vmem:[%s1955_s2 + $0xc0] sm:$0xff]   ;;  %1388 = vmatprep.subr.bf16.mxu0 %v1501_v0  ;;  %v1506_v5 = vld [vmem:[%s1955_s2 + $0xc8] sm:$0xff]   ;;  %v1510_v9 = vld [vmem:[%s1955_s2 + $0xd0] sm:$0xff]  }
   0x3   :  { %v1503_v2 = vld [vmem:[%s1955_s2] sm:$0xff]   ;;  %1410 = vmatprep.subr.bf16.mxu1 %v1502_v1  ;;  %v1507_v6 = vld [vmem:[%s1955_s2 + $0x8] sm:$0xff]   ;;  %v1511_v10 = vld [vmem:[%s1955_s2 + $0x10] sm:$0xff]  }
   0x4   :  { %v1504_v3 = vld [vmem:[%s1955_s2 + $0x80] sm:$0xff]   ;;  %1389 = vmatpush3.bf16.msra.mxu0 %v1503_v2  ;;  %v1508_v7 = vld [vmem:[%s1955_s2 + $0x88] sm:$0xff]   ;;  %v1512_v11 = vld [vmem:[%s1955_s2 + $0x90] sm:$0xff]  }
   0x5   :  { %1411 = vmatpush3.bf16.msra.mxu1 %v1504_v3  ;;  %1390 = vmatprep.subr.bf16.mxu0 %v1505_v4  ;;  %v1513_v12 = vld [vmem:[%s1955_s2 + $0x58] sm:$0xff]   ;;  %v1517_v16 = vld [vmem:[%s1955_s2 + $0x60] sm:$0xff]   ;;  %v1521_v20 = vld [vmem:[%s1955_s2 + $0x68] sm:$0xff]  }
   0x6   :  { %1412 = vmatprep.subr.bf16.mxu1 %v1506_v5  ;;  %v1514_v13 = vld [vmem:[%s1955_s2 + $0xd8] sm:$0xff]   ;;  %v1518_v17 = vld [vmem:[%s1955_s2 + $0xe0] sm:$0xff]   ;;  %v1522_v21 = vld [vmem:[%s1955_s2 + $0xe8] sm:$0xff]  }
   0x7   :  { %v1515_v14 = vld [vmem:[%s1955_s2 + $0x18] sm:$0xff]   ;;  %v1519_v18 = vld [vmem:[%s1955_s2 + $0x20] sm:$0xff]   ;;  %v1523_v22 = vld [vmem:[%s1955_s2 + $0x28] sm:$0xff]  }
   0x8   :  { %1391 = vmatpush3.bf16.msra.mxu0 %v1507_v6  ;;  %v1516_v15 = vld [vmem:[%s1955_s2 + $0x98] sm:$0xff]   ;;  %v1520_v19 = vld [vmem:[%s1955_s2 + $0xa0] sm:$0xff]   ;;  %v1524_v23 = vld [vmem:[%s1955_s2 + $0xa8] sm:$0xff]  }
   0x9   :  { %1413 = vmatpush3.bf16.msra.mxu1 %v1508_v7  ;;  %1392 = vmatprep.subr.bf16.mxu0 %v1509_v8  ;;  %v1525_v24 = vld [vmem:[%s1955_s2 + $0x70] sm:$0xff]   ;;  %v1529_v28 = vld [vmem:[%s1955_s2 + $0x78] sm:$0xff]   ;;  %v38_v32 = vld [vmem:[%s1956_s0] sm:$0xff] }
   0xa   :  { %1414 = vmatprep.subr.bf16.mxu1 %v1510_v9  ;;  %v1526_v25 = vld [vmem:[%s1955_s2 + $0xf0] sm:$0xff]   ;;  %v1530_v29 = vld [vmem:[%s1955_s2 + $0xf8] sm:$0xff]   ;;  %v39_v33 = vld [vmem:[%s1956_s0 + $0x8] sm:$0xff]  ;;  %v1282_v34 = vcombine.low %v38_v32, %v38_v32  ;;  %v1283_v35 = vcombine.high %v38_v32, %v38_v32 }
   0xb   :  { %v1527_v26 = vld [vmem:[%s1955_s2 + $0x30] sm:$0xff]   ;;  %v1531_v30 = vld [vmem:[%s1955_s2 + $0x38] sm:$0xff]   ;;  %v1284_v36 = vcombine.low %v39_v33, %v39_v33  ;;  %v1285_v37 = vcombine.high %v39_v33, %v39_v33  ;;  %v1537_v38 = vld [vmem:[%s1955_s2 + $0x140] sm:$0xff]  }
   0xc   :  { %1393 = vmatpush3.bf16.msra.mxu0 %v1511_v10  ;;  %v1528_v27 = vld [vmem:[%s1955_s2 + $0xb0] sm:$0xff]   ;;  %v1532_v31 = vld [vmem:[%s1955_s2 + $0xb8] sm:$0xff]   ;;  %v1538_v39 = vld [vmem:[%s1955_s2 + $0x1c0] sm:$0xff]   ;;  %621 = vmatprep.mubr.bf16.mxu0 %v1283_v35 }
   0xd   :  { %1415 = vmatpush3.bf16.msra.mxu1 %v1512_v11  ;;  %1394 = vmatprep.subr.bf16.mxu0 %v1513_v12  ;;  %v1539_v40 = vld [vmem:[%s1955_s2 + $0x100] sm:$0xff]   ;;  %v1541_v42 = vld [vmem:[%s1955_s2 + $0x148] sm:$0xff]   ;;  %v1545_v46 = vld [vmem:[%s1955_s2 + $0x150] sm:$0xff]  }
   0xe   :  { %1416 = vmatprep.subr.bf16.mxu1 %v1514_v13  ;;  %661 = vmatprep.mubr.bf16.mxu1 %v1285_v37  ;;  %v1540_v41 = vld [vmem:[%s1955_s2 + $0x180] sm:$0xff]   ;;  %v1542_v43 = vld [vmem:[%s1955_s2 + $0x1c8] sm:$0xff]   ;;  %v1546_v47 = vld [vmem:[%s1955_s2 + $0x1d0] sm:$0xff]   ;;  %v1593_v13 = vmov 0.0  }
   0xf   :  { %v1543_v44 = vld [vmem:[%s1955_s2 + $0x108] sm:$0xff]   ;;  %v1547_v48 = vld [vmem:[%s1955_s2 + $0x110] sm:$0xff]   ;;  %v1549_v50 = vld [vmem:[%s1955_s2 + $0x158] sm:$0xff]  }
  0x10   :  { %1395 = vmatpush3.bf16.msra.mxu0 %v1515_v14  ;;  %v1544_v45 = vld [vmem:[%s1955_s2 + $0x188] sm:$0xff]   ;;  %v1548_v49 = vld [vmem:[%s1955_s2 + $0x190] sm:$0xff]   ;;  %v1550_v51 = vld [vmem:[%s1955_s2 + $0x1d8] sm:$0xff]  }
  0x11   :  { %1417 = vmatpush3.bf16.msra.mxu1 %v1516_v15  ;;  %1396 = vmatprep.subr.bf16.mxu0 %v1517_v16  ;;  %v1551_v52 = vld [vmem:[%s1955_s2 + $0x118] sm:$0xff]   ;;  %v1553_v54 = vld [vmem:[%s1955_s2 + $0x160] sm:$0xff]   ;;  %v1557_v58 = vld [vmem:[%s1955_s2 + $0x168] sm:$0xff]  }
  0x12   :  { %1418 = vmatprep.subr.bf16.mxu1 %v1518_v17  ;;  %v1552_v53 = vld [vmem:[%s1955_s2 + $0x198] sm:$0xff]   ;;  %v1554_v55 = vld [vmem:[%s1955_s2 + $0x1e0] sm:$0xff]   ;;  %v1558_v59 = vld [vmem:[%s1955_s2 + $0x1e8] sm:$0xff]  }
  0x13   :  { %v1555_v56 = vld [vmem:[%s1955_s2 + $0x120] sm:$0xff]   ;;  %v1559_v60 = vld [vmem:[%s1955_s2 + $0x128] sm:$0xff]   ;;  %v1561_v62 = vld [vmem:[%s1955_s2 + $0x170] sm:$0xff]  }
  0x14   :  { %1397 = vmatpush3.bf16.msra.mxu0 %v1519_v18  ;;  %v1556_v57 = vld [vmem:[%s1955_s2 + $0x1a0] sm:$0xff]   ;;  %v1560_v61 = vld [vmem:[%s1955_s2 + $0x1a8] sm:$0xff]   ;;  %v1562_v63 = vld [vmem:[%s1955_s2 + $0x1f0] sm:$0xff]  }
  0x15   :  { %1419 = vmatpush3.bf16.msra.mxu1 %v1520_v19  ;;  %1398 = vmatprep.subr.bf16.mxu0 %v1521_v20  ;;  %v1563_v0 = vld [vmem:[%s1955_s2 + $0x130] sm:$0xff]   ;;  %v1565_v2 = vld [vmem:[%s1955_s2 + $0x178] sm:$0xff]   ;;  %v1573_v12 = vld [vmem:[%s1957_s4] sm:$0xff]  }
  0x16   :  { %1420 = vmatprep.subr.bf16.mxu1 %v1522_v21  ;;  %v1564_v1 = vld [vmem:[%s1955_s2 + $0x1b0] sm:$0xff]   ;;  %v1566_v3 = vld [vmem:[%s1955_s2 + $0x1f8] sm:$0xff]   ;;  %v1574_v14 = vld [vmem:[%s1957_s4 + $0x8] sm:$0xff]  }
  0x17   :  { %v1567_v4 = vld [vmem:[%s1955_s2 + $0x138] sm:$0xff]   ;;  %v40_v6 = vld [vmem:[%s1956_s0 + $0x10] sm:$0xff]  ;;  %v821_v15 = vld [vmem:[%s1958_s1] sm:$0xff] }
  0x18   :  { %1399 = vmatpush3.bf16.msra.mxu0 %v1523_v22  ;;  %v1568_v5 = vld [vmem:[%s1955_s2 + $0x1b8] sm:$0xff]   ;;  %v1286_v7 = vcombine.low %v40_v6, %v40_v6  ;;  %v1287_v8 = vcombine.high %v40_v6, %v40_v6  ;;  %823 = vrot.lane.b32.xlu0 %v821_v15, %s1595_s24  ;;  %v1281_v18 = vld [vmem:[%s1959_s3] ss:$0 sm:$0xff] }
  0x19   :  { %1421 = vmatpush3.bf16.msra.mxu1 %v1524_v23  ;;  %1400 = vmatprep.subr.bf16.mxu0 %v1525_v24  ;;  %v41_v9 = vld [vmem:[%s1956_s0 + $0x18] sm:$0xff] }
  0x1a   :  { %1422 = vmatprep.subr.bf16.mxu1 %v1526_v25  ;;  %v1288_v10 = vcombine.low %v41_v9, %v41_v9  ;;  %v1289_v11 = vcombine.high %v41_v9, %v41_v9 }
  0x1c   :  { %1401 = vmatpush3.bf16.msra.mxu0 %v1527_v26 }
  0x1d   :  { %1423 = vmatpush3.bf16.msra.mxu1 %v1528_v27  ;;  %1402 = vmatprep.subr.bf16.mxu0 %v1529_v28 }
  0x1e   :  { %1424 = vmatprep.subr.bf16.mxu1 %v1530_v29 }
  0x20   :  { %1403 = vmatpush3.bf16.msra.mxu0 %v1531_v30 }
  0x21   :  { %1425 = vmatpush3.bf16.msra.mxu1 %v1532_v31  ;;  %1432 = vmatprep.subr.bf16.mxu0 %v1537_v38 }
  0x22   :  { %1454 = vmatprep.subr.bf16.mxu1 %v1538_v39 }
  0x23   :  { %622 = vmatmul.mubr.bf16.vlgmr.msra.gmra.mrb[0].mxu0 %v1282_v34 }
  0x24   :  { %662 = vmatmul.mubr.bf16.vlgmr.msra.gmra.mrb[0].mxu1 %v1284_v36  ;;  %1433 = vmatpush3.bf16.msra.mxu0 %v1539_v40 }
  0x25   :  { %1455 = vmatpush3.bf16.msra.mxu1 %v1540_v41  ;;  %1434 = vmatprep.subr.bf16.mxu0 %v1541_v42 }
  0x26   :  { %1456 = vmatprep.subr.bf16.mxu1 %v1542_v43  ;;  %701 = vmatprep.mubr.bf16.mxu0 %v1287_v8  ;;  %v833_v43 = vld [vmem:[%s1960_s6] sm:$0xf] }
  0x27   :  { %741 = vmatprep.mubr.bf16.mxu1 %v1289_v11  ;;  %v893_v11 = vld [vmem:[%s1962_s8 + $0x10] sm:$0xff] }
  0x28   :  { %1435 = vmatpush3.bf16.msra.mxu0 %v1543_v44  ;;  %v847_v44 = vsel %vm845_vm2, %v833_v43, 0  ;;  %v907_v43 = vld [vmem:[%s1965_s9] sm:$0xff] }
  0x29   :  { %1457 = vmatpush3.bf16.msra.mxu1 %v1544_v45  ;;  %1436 = vmatprep.subr.bf16.mxu0 %v1545_v46  ;;  %v1354_v45 = vld [vmem:[%s1961_s5] ss:$0 sm:$0xff] }
  0x2a   :  { %1458 = vmatprep.subr.bf16.mxu1 %v1546_v47 }
  0x2c   :  { %1437 = vmatpush3.bf16.msra.mxu0 %v1547_v48 }
  0x2d   :  { %1459 = vmatpush3.bf16.msra.mxu1 %v1548_v49  ;;  %1438 = vmatprep.subr.bf16.mxu0 %v1549_v50 }
  0x2e   :  { %1460 = vmatprep.subr.bf16.mxu1 %v1550_v51 }
  0x30   :  { %1439 = vmatpush3.bf16.msra.mxu0 %v1551_v52 }
  0x31   :  { %1461 = vmatpush3.bf16.msra.mxu1 %v1552_v53  ;;  %1440 = vmatprep.subr.bf16.mxu0 %v1553_v54 }
  0x32   :  { %1462 = vmatprep.subr.bf16.mxu1 %v1554_v55 }
  0x34   :  { %1441 = vmatpush3.bf16.msra.mxu0 %v1555_v56  ;;  %v891_v56 = vld [vmem:[%s1962_s8] sm:$0xff] }
  0x35   :  { %1463 = vmatpush3.bf16.msra.mxu1 %v1556_v57  ;;  %1442 = vmatprep.subr.bf16.mxu0 %v1557_v58  ;;  %v895_v57 = vld [vmem:[%s1962_s8 + $0x20] sm:$0xff]  ;;  %v892_v58 = vld [vmem:[%s1962_s8 + $0x8] sm:$0xff] }
  0x36   :  { %1464 = vmatprep.subr.bf16.mxu1 %v1558_v59  ;;  %v1360_v59 = vcombine.low %v891_v56, %v895_v57 }
  0x38   :  { %1443 = vmatpush3.bf16.msra.mxu0 %v1559_v60  ;;  %v1361_v60 = vcombine.high %v891_v56, %v895_v57 }
  0x39   :  { %1465 = vmatpush3.bf16.msra.mxu1 %v1560_v61  ;;  %1444 = vmatprep.subr.bf16.mxu0 %v1561_v62  ;;  %v896_v61 = vld [vmem:[%s1962_s8 + $0x28] sm:$0xff] }
  0x3a   :  { %1466 = vmatprep.subr.bf16.mxu1 %v1562_v63  ;;  %v1363_v62 = vcombine.high %v892_v58, %v896_v61 }
  0x3c   :  { %1445 = vmatpush3.bf16.msra.mxu0 %v1563_v0 }
  0x3d   :  { %1467 = vmatpush3.bf16.msra.mxu1 %v1564_v1  ;;  %1446 = vmatprep.subr.bf16.mxu0 %v1565_v2  ;;  %v1362_v1 = vcombine.low %v892_v58, %v896_v61 }
  0x3e   :  { %1468 = vmatprep.subr.bf16.mxu1 %v1566_v3  ;;  %v899_v3 = vld [vmem:[%s1962_s8 + $0x40] sm:$0xff] }
  0x40   :  { %1447 = vmatpush3.bf16.msra.mxu0 %v1567_v4  ;;  %v903_v4 = vld [vmem:[%s1962_s8 + $0x60] sm:$0xff] }
  0x41   :  { %1469 = vmatpush3.bf16.msra.mxu1 %v1568_v5  ;;  %1481 = vmatprep.subr.bf16.mxu0 %v1593_v13  ;;  %v900_v5 = vld [vmem:[%s1962_s8 + $0x48] sm:$0xff]  ;;  %v1369_v6 = vcombine.high %v899_v3, %v903_v4  ;;  %v1368_v8 = vcombine.low %v899_v3, %v903_v4 }
  0x42   :  { %1489 = vmatprep.subr.bf16.mxu1 %v1593_v13 }
  0x43   :  { %702 = vmatmul.mubr.bf16.vlgmr.msra.gmra.mrb[4].mxu0 %v1286_v7  ;;  %v904_v7 = vld [vmem:[%s1962_s8 + $0x68] sm:$0xff] }
  0x44   :  { %742 = vmatmul.mubr.bf16.vlgmr.msra.gmra.mrb[4].mxu1 %v1288_v10  ;;  %1482 = vmatpush3.bf16.msra.mxu0 %v1573_v12  ;;  %v1370_v9 = vcombine.low %v900_v5, %v904_v7  ;;  %v1371_v10 = vcombine.high %v900_v5, %v904_v7  ;;  %v897_v12 = vld [vmem:[%s1962_s8 + $0x30] sm:$0xff] }
  0x45   :  { %1483 = vmatprep.subr.bf16.mxu0 %v1593_v13  ;;  %1485 = vmatprep.mubr.msk.bf16.mxu0 %vm1594_vm0, %v1593_v13  ;;  %v1365_v15 = vcombine.high %v893_v11, %v897_v12 }
  0x46   :  { %1491 = vmatprep.mubr.msk.bf16.mxu1 %vm1594_vm0, %v1593_v13  ;;  %1490 = vmatpush3.bf16.msra.mxu1 %v847_v44  ;;  %v894_v13 = vld [vmem:[%s1962_s8 + $0x18] sm:$0xff] }
  0x47   :  { %1073 = vmatprep.subr.bf16.mxu1 %v1363_v62 }
  0x48   :  { %1484 = vmatpush3.bf16.msra.mxu0 %v1574_v14  ;;  %v1364_v14 = vcombine.low %v893_v11, %v897_v12 }
  0x49   :  { %1032 = vmatprep.subr.bf16.mxu0 %v1361_v60 }
  0x8a   :  { %v824_v53 = vpop.permute.xlu0 %823 }
  0xf6   :  { %v1404_v16 = vpop.f32.mrb[0].mxu0 }
  0xf7   :  { %v1426_v17 = vpop.f32.mrb[0].mxu1  ;;  %v1405_v19 = vpop.f32.mrb[1].mxu0 }
  0xf8   :  { %v1427_v20 = vpop.f32.mrb[1].mxu1  ;;  %v1406_v21 = vadd.f32 %v1405_v19, %v1404_v16  ;;  %v1407_v23 = vpop.f32.mrb[2].mxu0  ;;  %v898_v16 = vld [vmem:[%s1962_s8 + $0x38] sm:$0xff] }
  0xf9   :  { %v1428_v22 = vadd.f32 %v1427_v20, %v1426_v17  ;;  %v1429_v24 = vpop.f32.mrb[2].mxu1  ;;  %v1408_v25 = vpop.f32.mrb[3].mxu0  ;;  %v1598_v17 = vmov 0   ;;  %v1367_v19 = vcombine.high %v894_v13, %v898_v16  ;;  %v1358_v23 = vld [vmem:[%s1964_s7] ss:$0 sm:$0xff] }
  0xfa   :  { %v1430_v26 = vpop.f32.mrb[3].mxu1  ;;  %v624_v27 = vadd.f32 %v1406_v21, %v1281_v18  ;;  %v1366_v18 = vcombine.low %v894_v13, %v898_v16 }
  0xfc   :  { %v664_v28 = vadd.f32 %v1428_v22, %v624_v27  ;;  %v901_v27 = vld [vmem:[%s1962_s8 + $0x50] sm:$0xff] }
 0x116   :  { %v1448_v29 = vpop.f32.mrb[4].mxu0 }
 0x117   :  { %v1470_v30 = vpop.f32.mrb[4].mxu1  ;;  %v1449_v31 = vpop.f32.mrb[5].mxu0 }
 0x118   :  { %v1471_v32 = vpop.f32.mrb[5].mxu1  ;;  %v1450_v33 = vadd.f32 %v1449_v31, %v1448_v29  ;;  %v1451_v35 = vpop.f32.mrb[6].mxu0  ;;  %v905_v29 = vld [vmem:[%s1962_s8 + $0x70] sm:$0xff]  ;;  %v906_v31 = vld [vmem:[%s1962_s8 + $0x78] sm:$0xff] }
 0x119   :  { %v1472_v34 = vadd.f32 %v1471_v32, %v1470_v30  ;;  %v1473_v36 = vpop.f32.mrb[6].mxu1  ;;  %v1452_v37 = vpop.f32.mrb[7].mxu0  ;;  %v902_v30 = vld [vmem:[%s1962_s8 + $0x58] sm:$0xff]  ;;  %v1373_v35 = vcombine.high %v901_v27, %v905_v29 }
 0x11a   :  { %v1474_v38 = vpop.f32.mrb[7].mxu1  ;;  %v704_v39 = vadd.f32 %v1450_v33, %v664_v28  ;;  %v1375_v36 = vcombine.high %v902_v30, %v906_v31  ;;  %v1372_v37 = vcombine.low %v901_v27, %v905_v29 }
 0x11b   :  { %v1374_v38 = vcombine.low %v902_v30, %v906_v31 }
 0x11c   :  { %v744_v40 = vadd.f32 %v1472_v34, %v704_v39  ;;  %v909_v39 = vlaneseq }
 0x11e   :  { %v749_v41 = vmax.f32 %v744_v40, 0.0  ;;  %v910_v40 = vshrl.u32 %v909_v39, 7 }
 0x120   :  { %v750_v42 = vpack.c.bf16 %v749_v41, %v749_v41  ;;  %v911_v41 = vsub.s32 0, %v910_v40  ;;  %v915_v44 = vsub.s32 1, %v910_v40  ;;  %v927_v56 = vsub.s32 4, %v910_v40 }
 0x121   :  { %v935_v57 = vsub.s32 6, %v910_v40  ;;  %v931_v62 = vsub.s32 5, %v910_v40 }
 0x122   :  { %1486 = vmatmul.mubr.msk.bf16.vlgmr.msra.gmra.mrb[8].mxu0 %vm774_vm1, %v750_v42  ;;  %v919_v42 = vsub.s32 2, %v910_v40 }
 0x123   :  { %1033 = vmatpush1.bf16.msra.mxu0 %v1360_v59  ;;  %1064 = vmatprep.mubr.bf16.mxu0 %v1598_v17  ;;  %v936_v7 = vrot.slane %v907_v43, %v935_v57 }
 0x124   :  { %1034 = vmatprep.subr.bf16.mxu0 %v1369_v6  ;;  %v928_v6 = vrot.slane %v907_v43, %v927_v56 }
 0x127   :  { %1035 = vmatpush1.bf16.msra.mxu0 %v1368_v8  ;;  %v932_v8 = vrot.slane %v907_v43, %v931_v62 }
 0x128   :  { %1114 = vmatprep.subr.bf16.mxu0 %v1365_v15 }
 0x1f5   :  { %v812_v46 = vpop.f32.mrb[8].mxu0 }
 0x1f6   :  { %v813_v47 = vadd.f32 %v1354_v45, %v812_v46  ;;  %v1487_v48 = vpop.f32.mrb[9].mxu0  ;;  %v923_v45 = vsub.s32 3, %v910_v40  ;;  %v912_v46 = vrot.slane %v907_v43, %v911_v41 }
 0x1f7   :  { %v815_v49 = vpop.f32.mrb[10].mxu0  ;;  %v916_v48 = vrot.slane %v907_v43, %v915_v44 }
 0x1f8   :  { %v818_v50 = vmul.f32 0.5, %v813_v47  ;;  %v1488_v51 = vpop.f32.mrb[11].mxu0  ;;  %v924_v49 = vrot.slane %v907_v43, %v923_v45 }
 0x1fa   :  { %v819_v52 = vmul.f32 1.442695, %v818_v50 }
 0x1fc   :  { %1575 = vpow2.f32 %v819_v52 }
 0x206   :  { %v1576_v54 = vpop.eup %1575 }
 0x207   :  { %v826_v55 = vmul.f32 %v1576_v54, %v824_v53 }
 0x209   :  { %828 = vrot.lane.b32.xlu0 %v826_v55, %s1596_s28 }
 0x27b   :  { %v829_v63 = vpop.permute.xlu0 %828 }
 0x27c   :  { %v831_v0 = vadd.f32 %v829_v63, %v813_v47  ;;  %v939_v63 = vsub.s32 7, %v910_v40 }
 0x27e   :  { %v832_v2 = vpack.c.bf16 %v831_v0, %v831_v0  ;;  %1265 = vrot.lane.b32.xlu1 %v831_v0, %s1597_s16 }
 0x280   :  { %1492 = vmatmul.mubr.msk.bf16.vlgmr.msra.gmra.mrb[8].mxu1 %vm841_vm3, %v832_v2 }
 0x281   :  { %1074 = vmatpush1.bf16.msra.mxu1 %v1362_v1  ;;  %1105 = vmatprep.mubr.bf16.mxu1 %v1598_v17 }
 0x282   :  { %1075 = vmatprep.subr.bf16.mxu1 %v1371_v10 }
 0x285   :  { %1076 = vmatpush1.bf16.msra.mxu1 %v1370_v9  ;;  %v940_v9 = vrot.slane %v907_v43, %v939_v63 }
 0x286   :  { %1155 = vmatprep.subr.bf16.mxu1 %v1367_v19 }
 0x2f0   :  { %v1266_v20 = vpop.permute.xlu1 %1265 }
 0x2f1   :  { %v1269_v21 = vsel %vm1268_vm4, %v813_v47, %v1266_v20  ;;  %v920_v47 = vrot.slane %v907_v43, %v919_v42 }
 0x2f2   :  { %v1271_v22 = vsel %vm1270_vm5, %v1269_v21, 0.0 }
 0x2f3   :  { %1272 = vst [vmem:[%s1963_s11] sm:$0xff] %v1271_v22 }
 0x353   :  { %v883_v24 = vpop.f32.mrb[8].mxu1 }
 0x354   :  { %v884_v25 = vadd.f32 %v1358_v23, %v883_v24  ;;  %v1493_v26 = vpop.f32.mrb[9].mxu1 }
 0x355   :  { %v886_v28 = vpop.f32.mrb[10].mxu1 }
 0x356   :  { %v889_v32 = vmax.f32 %v884_v25, 0.0  ;;  %v1494_v33 = vpop.f32.mrb[11].mxu1 }
 0x358   :  { %v890_v34 = vpack.c.bf16 %v889_v32, %v889_v32 }
 0x35a   :  { %1376 = vmatmul.mubr.msk.bf16.vlgmr.msra.gmra.mrb[12].mxu0 %vm774_vm1, %v890_v34  ;;  %1377 = vmatmul.mubr.msk.bf16.vlgmr.msra.gmra.mrb[12].mxu1 %vm774_vm1, %v890_v34 }
 0x35b   :  { %1115 = vmatpush1.bf16.msra.mxu0 %v1364_v14  ;;  %1156 = vmatpush1.bf16.msra.mxu1 %v1366_v18 }
 0x35c   :  { %1116 = vmatprep.subr.bf16.mxu0 %v1373_v35  ;;  %1157 = vmatprep.subr.bf16.mxu1 %v1375_v36 }
 0x35d   :  { %1146 = vmatprep.mubr.bf16.mxu0 %v1598_v17  ;;  %1187 = vmatprep.mubr.bf16.mxu1 %v1598_v17 }
 0x35f   :  { %1117 = vmatpush1.bf16.msra.mxu0 %v1372_v37  ;;  %1158 = vmatpush1.bf16.msra.mxu1 %v1374_v38 }
 0x362   :  { %1378 = vmatmul.mubr.msk.bf16.vlgmr.msra.gmra.mrb[16].mxu0 %vm774_vm1, %v890_v34  ;;  %1379 = vmatmul.mubr.msk.bf16.vlgmr.msra.gmra.mrb[16].mxu1 %vm774_vm1, %v890_v34 }
 0x42d   :  { %v1066_v50 = vpop.f32.mrb[12].mxu0  ;;  %v1107_v51 = vpop.f32.mrb[12].mxu1 }
 0x42e   :  { %v1067_v52 = vadd.f32 %v1066_v50, %v912_v46  ;;  %v1108_v53 = vadd.f32 %v1107_v51, %v920_v47  ;;  %v1068_v54 = vpop.f32.mrb[13].mxu0  ;;  %v1109_v55 = vpop.f32.mrb[13].mxu1 }
 0x42f   :  { %v1069_v58 = vadd.f32 %v1068_v54, %v916_v48  ;;  %v1110_v59 = vadd.f32 %v1109_v55, %v924_v49  ;;  %v1070_v60 = vpop.f32.mrb[14].mxu0  ;;  %v1111_v61 = vpop.f32.mrb[14].mxu1 }
 0x430   :  { %v1196_v0 = vmul.f32 0.5, %v1067_v52  ;;  %v1198_v1 = vmul.f32 0.5, %v1108_v53  ;;  %v1071_v2 = vpop.f32.mrb[15].mxu0  ;;  %v1112_v3 = vpop.f32.mrb[15].mxu1 }
 0x431   :  { %v1197_v4 = vmul.f32 0.5, %v1069_v58  ;;  %v1199_v5 = vmul.f32 0.5, %v1110_v59 }
 0x432   :  { %1577 = vtanh.f32 %v1196_v0 }
 0x433   :  { %1579 = vtanh.f32 %v1198_v1 }
 0x434   :  { %1581 = vtanh.f32 %v1197_v4 }
 0x435   :  { %1583 = vtanh.f32 %v1199_v5  ;;  %v1148_v10 = vpop.f32.mrb[16].mxu0  ;;  %v1189_v11 = vpop.f32.mrb[16].mxu1 }
 0x436   :  { %v1149_v12 = vadd.f32 %v1148_v10, %v928_v6  ;;  %v1190_v13 = vadd.f32 %v1189_v11, %v936_v7  ;;  %v1150_v14 = vpop.f32.mrb[17].mxu0  ;;  %v1191_v15 = vpop.f32.mrb[17].mxu1 }
 0x437   :  { %v1151_v16 = vadd.f32 %v1150_v14, %v932_v8  ;;  %v1192_v17 = vadd.f32 %v1191_v15, %v940_v9  ;;  %v1152_v18 = vpop.f32.mrb[18].mxu0  ;;  %v1193_v19 = vpop.f32.mrb[18].mxu1 }
 0x438   :  { %v1200_v20 = vmul.f32 0.5, %v1149_v12  ;;  %v1202_v21 = vmul.f32 0.5, %v1190_v13  ;;  %v1153_v22 = vpop.f32.mrb[19].mxu0  ;;  %v1194_v23 = vpop.f32.mrb[19].mxu1 }
 0x439   :  { %v1201_v24 = vmul.f32 0.5, %v1151_v16  ;;  %v1203_v25 = vmul.f32 0.5, %v1192_v17 }
 0x43a   :  { %1585 = vtanh.f32 %v1200_v20 }
 0x43b   :  { %1587 = vtanh.f32 %v1202_v21 }
 0x43c   :  { %v1578_v26 = vpop.eup %1577  ;;  %1589 = vtanh.f32 %v1201_v24 }
 0x43d   :  { %v1580_v27 = vpop.eup %1579  ;;  %v1212_v28 = vmul.f32 0.5, %v1578_v26  ;;  %1591 = vtanh.f32 %v1203_v25 }
 0x43e   :  { %v1582_v29 = vpop.eup %1581  ;;  %v1214_v30 = vmul.f32 0.5, %v1580_v27 }
 0x43f   :  { %v1584_v31 = vpop.eup %1583  ;;  %v1220_v32 = vadd.f32 0.5, %v1212_v28  ;;  %v1213_v33 = vmul.f32 0.5, %v1582_v29 }
 0x440   :  { %v1222_v34 = vadd.f32 0.5, %v1214_v30  ;;  %v1215_v35 = vmul.f32 0.5, %v1584_v31 }
 0x441   :  { %v1221_v36 = vadd.f32 0.5, %v1213_v33 }
 0x442   :  { %v1223_v37 = vadd.f32 0.5, %v1215_v35 }
 0x443   :  { %v1384_v38 = vpack.c.bf16 %v1221_v36, %v1220_v32 }
 0x444   :  { %v1586_v39 = vpop.eup %1585  ;;  %v1385_v40 = vpack.c.bf16 %v1223_v37, %v1222_v34 }
 0x445   :  { %v1588_v41 = vpop.eup %1587  ;;  %1260 = vst [vmem:[%s1966_s10] sm:$0xff] %v1384_v38  ;;  %v1216_v42 = vmul.f32 0.5, %v1586_v39 }
 0x446   :  { %v1590_v43 = vpop.eup %1589  ;;  %1261 = vst [vmem:[%s1966_s10 + $0x8] sm:$0xff] %v1385_v40  ;;  %v1218_v44 = vmul.f32 0.5, %v1588_v41 }
 0x447   :  { %v1592_v45 = vpop.eup %1591  ;;  %v1224_v46 = vadd.f32 0.5, %v1216_v42  ;;  %v1217_v47 = vmul.f32 0.5, %v1590_v43 }
 0x448   :  { %v1226_v48 = vadd.f32 0.5, %v1218_v44  ;;  %v1219_v49 = vmul.f32 0.5, %v1592_v45 }
 0x449   :  { %v1225_v50 = vadd.f32 0.5, %v1217_v47 }
 0x44a   :  { %v1227_v51 = vadd.f32 0.5, %v1219_v49 }
 0x44b   :  { %v1386_v52 = vpack.c.bf16 %v1225_v50, %v1224_v46 }
 0x44c   :  { %v1387_v53 = vpack.c.bf16 %v1227_v51, %v1226_v48 }
 0x44d   :  { %1262 = vst [vmem:[%s1966_s10 + $0x10] sm:$0xff] %v1386_v52 }
 0x44e   :  { %1263 = vst [vmem:[%s1966_s10 + $0x18] sm:$0xff] %v1387_v53 }

</bundles_post_ra>
